<compile_context>
chip_gen: v6e
topology: v6e:2x2x1
jax: 0.10.0
libtpu: 0.0.40
codegen_flags: <defaults>
</compile_context>

<pallas_src>
import math
from functools import partial

import numpy as np
import jax
import jax.numpy as jnp
from jax import lax
from jax.experimental import pallas as pl
from jax.experimental.pallas import tpu as pltpu


# --------------------------------------------------------------------------
# Host-side construction of 1-D interpolation matrices (PyTorch semantics,
# align_corners=False, scale_factor provided -> ratio = 1/scale_factor,
# recompute_scale_factor=False i.e. the modern PyTorch default).
# --------------------------------------------------------------------------
def _interp_matrix_1d(in_size, out_size, ratio, method):
    m = np.zeros((out_size, in_size), dtype=np.float32)
    for i in range(out_size):
        if method == "nearest":
            j = min(int(math.floor(i * ratio)), in_size - 1)
            m[i, j] = 1.0
        else:  # 'linear' / 'bilinear'
            src = max(ratio * (i + 0.5) - 0.5, 0.0)
            j0 = min(int(math.floor(src)), in_size - 1)
            j1 = min(j0 + 1, in_size - 1)
            lam = src - math.floor(src)
            m[i, j0] += 1.0 - lam
            m[i, j1] += lam
    return m


def _vmem_budget_bytes():
    # Cap the VMEM request at ~75% of physical per-core capacity (v7x: 64 MiB,
    # v5e/v6e: 128 MiB) so double-buffering / compiler scratch keep headroom.
    cap = 64 << 20
    try:
        info = pltpu.get_tpu_info()
        cap = int(getattr(info, "vmem_capacity_bytes", cap))
    except Exception:
        pass
    return (cap * 3) // 4


# --------------------------------------------------------------------------
# Pallas kernel: one program per batch group of Bt images.
# refs = (x_ref, [wwT_0, wh_0, ..., wwT_{S-1}, wh_{S-1}], [w_ch], [bias], o_ref)
#   x_ref : (Bt, C, H0, W0)        input block (original dtype)
#   wwT_s : (W_in_s, W_out_s)      bf16, W-axis interpolation (pre-transposed)
#   wh_s  : (H_out_s, H_in_s)      bf16, H-axis interpolation
#   w_ch  : (Co, C)   f32, SMEM    1x1 conv weights (read as scalars)
#   bias  : (Co,)     f32, SMEM    per-output-channel bias
#   o_ref : (Bt, Co, Hf, Wf)
# --------------------------------------------------------------------------
def _rescaler_kernel(*refs, n_stages, remap, has_bias):
    x_ref = refs[0]
    o_ref = refs[-1]
    mat_refs = refs[1:1 + 2 * n_stages]
    idx = 1 + 2 * n_stages
    w_ref = refs[idx] if remap else None
    b_ref = refs[idx + 1] if (remap and has_bias) else None

    Bt, C, H, W = x_ref.shape
    G = Bt * C

    # bf16 operands, f32 accumulation on the MXU; leading-dim merge is free.
    xf = x_ref[...].astype(jnp.bfloat16).reshape(G, H, W)

    for s in range(n_stages):
        ww_t = mat_refs[2 * s][...]          # (W_in, W_out)  bf16
        wh = mat_refs[2 * s + 1][...]        # (H_out, H_in)  bf16

        # W resize: batched matmul over the G=Bt*C axis (W stays on lanes).
        wwb = jnp.broadcast_to(ww_t[None], (G,) + ww_t.shape)
        xf = lax.dot_general(
            xf, wwb, (((2,), (1,)), ((0,), (0,))),
            preferred_element_type=jnp.float32).astype(jnp.bfloat16)  # (G, H_in, W_out)

        # H resize: batched matmul, plain (H_out, H_in) matrix (no kron zeros).
        whb = jnp.broadcast_to(wh[None], (G,) + wh.shape)
        cast_to = jnp.float32 if (remap and s == n_stages - 1) else jnp.bfloat16
        xf = lax.dot_general(
            whb, xf, (((2,), (1,)), ((0,), (0,))),
            preferred_element_type=jnp.float32).astype(cast_to)       # (G, H_out, W_out)

    Hf, Wf = xf.shape[1], xf.shape[2]

    if remap:
        Co = o_ref.shape[1]
        xr = xf.astype(jnp.float32).reshape(Bt, C, Hf, Wf)
        outs = []
        for o in range(Co):                      # VPU channel contraction
            acc = w_ref[o, 0] * xr[:, 0]
            for c in range(1, C):
                acc = acc + w_ref[o, c] * xr[:, c]
            if has_bias:
                acc = acc + b_ref[o]
            outs.append(acc)
        o_ref[...] = jnp.stack(outs, axis=1).astype(o_ref.dtype)
    else:
        o_ref[...] = xf.reshape(Bt, C, Hf, Wf).astype(o_ref.dtype)


# --------------------------------------------------------------------------
# Module wrapper mirroring SpatialRescaler.forward
# --------------------------------------------------------------------------
class SpatialRescalerPallas:
    def __init__(self, n_stages=1, method="bilinear", multiplier=0.5,
                 in_channels=3, out_channels=None, bias=False, wrap_video=False,
                 kernel_size=1, remap_output=False, *, key=None):
        assert n_stages >= 0
        assert method in ["nearest", "linear", "bilinear", "trilinear",
                          "bicubic", "area"]
        if method not in ("nearest", "linear", "bilinear"):
            # TODO(synk): bicubic / trilinear / area interpolation not implemented
            raise NotImplementedError(f"method={method} not implemented")
        self.n_stages = n_stages
        self.method = method
        self.multiplier = multiplier
        self.in_channels = in_channels
        self.out_channels = out_channels
        self.wrap_video = wrap_video
        self.remap_output = out_channels is not None or remap_output

        self.w_ch = None
        self.b_ch = None
        if self.remap_output:
            if out_channels is None:
                raise ValueError("remap_output=True requires out_channels")
            if kernel_size != 1:
                # TODO(synk): kernel_size > 1 channel_mapper conv not implemented
                raise NotImplementedError("only kernel_size=1 channel_mapper supported")
            assert key is not None, "need a PRNG key to init channel_mapper weights"
            kw, kb = jax.random.split(key)
            bound = 1.0 / math.sqrt(in_channels * kernel_size * kernel_size)
            self.w_ch = jax.random.uniform(kw, (out_channels, in_channels),
                                           jnp.float32, -bound, bound)
            if bias:
                self.b_ch = jax.random.uniform(kb, (out_channels,),
                                               jnp.float32, -bound, bound)

    # ------------------------------------------------------------------
    def __call__(self, x):
        wrapped = self.wrap_video and x.ndim == 5
        if wrapped:
            B0, C0, T0 = x.shape[0], x.shape[1], x.shape[2]
            x = jnp.transpose(x, (0, 2, 1, 3, 4)).reshape(
                B0 * T0, C0, x.shape[3], x.shape[4])

        B, C, H, W = x.shape
        assert C == self.in_channels

        # static per-stage spatial sizes (PyTorch: out = floor(in * multiplier))
        sizes = [(H, W)]
        for _ in range(self.n_stages):
            hh, ww = sizes[-1]
            sizes.append((max(1, int(math.floor(hh * self.multiplier))),
                          max(1, int(math.floor(ww * self.multiplier)))))
        Hf, Wf = sizes[-1]
        Co = self.out_channels if self.remap_output else C

        if self.n_stages == 0 and not self.remap_output:
            out = x
        else:
            ratio = 1.0 / self.multiplier
            mats = []
            for s in range(self.n_stages):
                (hi, wi), (ho, wo) = sizes[s], sizes[s + 1]
                wh = _interp_matrix_1d(hi, ho, ratio, self.method)    # (ho, hi)
                ww_ = _interp_matrix_1d(wi, wo, ratio, self.method)   # (wo, wi)
                mats.append(jnp.asarray(ww_.T, dtype=jnp.bfloat16))   # (wi, wo)
                mats.append(jnp.asarray(wh, dtype=jnp.bfloat16))      # (ho, hi)
            has_bias = self.remap_output and (self.b_ch is not None)

            # --- per-batch-item working set (bytes) -> batch-group size Bt ---
            itemsize = x.dtype.itemsize
            per_item = C * H * W * itemsize + Co * Hf * Wf * itemsize
            for s in range(self.n_stages):
                (hi, wi), (ho, wo) = sizes[s], sizes[s + 1]
                per_item += C * (hi * wo + ho * wo + ho * hi) * 2     # bf16 temps
            if self.remap_output:
                per_item += (C + Co) * Hf * Wf * 4                    # f32 temps

            divisors = [d for d in range(1, B + 1) if B % d == 0]
            cands = [d for d in divisors
                     if d * per_item <= (2 << 20) and (B // d >= 2 or B == 1)]
            Bt = max(cands) if cands else 1
            n_steps = B // Bt
            # TODO(synk): when B == 1, add a second "parallel" grid axis (e.g.
            #             over output rows) so v7x's second TensorCore has work.

            # --- VMEM budget: actual need, capped at ~75% of physical VMEM ---
            mats_bytes = sum(int(np.prod(m.shape)) * m.dtype.itemsize for m in mats)
            need = 2 * Bt * per_item + mats_bytes + (2 << 20)
            vmem_limit = int(min(max(need, 16 << 20), _vmem_budget_bytes()))

            # --- cost estimate for XLA's scheduler ---
            flops = 0
            for s in range(self.n_stages):
                (hi, wi), (ho, wo) = sizes[s], sizes[s + 1]
                flops += 2 * B * C * hi * wi * wo     # W resize
                flops += 2 * B * C * ho * hi * wo     # H resize
            if self.remap_output:
                flops += 2 * B * Co * C * Hf * Wf
            bytes_accessed = (B * C * H * W * itemsize
                              + B * Co * Hf * Wf * itemsize + mats_bytes)
            ce = pl.CostEstimate(flops=int(flops), transcendentals=0,
                                 bytes_accessed=int(bytes_accessed))

            # --- specs ---
            inputs = [x]
            in_specs = [pl.BlockSpec((Bt, C, H, W), lambda g: (g, 0, 0, 0))]
            for m in mats:
                inputs.append(m)
                in_specs.append(pl.BlockSpec(m.shape, lambda g: (0, 0)))
            if self.remap_output:
                inputs.append(self.w_ch)
                in_specs.append(pl.BlockSpec(memory_space=pltpu.MemorySpace.SMEM))
                if has_bias:
                    inputs.append(self.b_ch)
                    in_specs.append(pl.BlockSpec(memory_space=pltpu.MemorySpace.SMEM))

            kernel = partial(_rescaler_kernel, n_stages=self.n_stages,
                             remap=self.remap_output, has_bias=has_bias)
            out = pl.pallas_call(
                kernel,
                out_shape=jax.ShapeDtypeStruct((B, Co, Hf, Wf), x.dtype),
                grid=(n_steps,),
                in_specs=in_specs,
                out_specs=pl.BlockSpec((Bt, Co, Hf, Wf), lambda g: (g, 0, 0, 0)),
                compiler_params=pltpu.CompilerParams(
                    dimension_semantics=("parallel",),
                    vmem_limit_bytes=vmem_limit),
                cost_estimate=ce,
            )(*inputs)

        if wrapped:
            out = jnp.transpose(out.reshape(B0, T0, Co, Hf, Wf), (0, 2, 1, 3, 4))
        return out

    def encode(self, x):
        return self(x)


# --------------------------------------------------------------------------
# Main
# --------------------------------------------------------------------------
if __name__ == "__main__":
    key = jax.random.PRNGKey(0)
    kx, kw = jax.random.split(key)

    B, Cin, H, W = 2, 3, 16, 16
    x = jax.random.normal(kx, (B, Cin, H, W), jnp.float32)

    # Config A (default SDXL-style usage): 1 bilinear x0.5 stage + 1x1 remap 3->4.
    resc_a = SpatialRescalerPallas(n_stages=1, method="bilinear", multiplier=0.5,
                                   in_channels=Cin, out_channels=4, bias=False,
                                   kernel_size=1, key=kw)
    out_a = resc_a(x)
    jax.block_until_ready(out_a)
    assert out_a.shape == (B, 4, 8, 8), out_a.shape
    # independent reference: bilinear x0.5 (align_corners=False) == 2x2 avg-pool,
    # then the 1x1 conv is a channel contraction.  Tolerance covers bf16 operands.
    pooled = x.reshape(B, Cin, 8, 2, 8, 2).mean(axis=(3, 5))
    ref_a = jnp.einsum("oc,bchw->bohw", resc_a.w_ch, pooled)
    assert jnp.allclose(out_a, ref_a, rtol=3e-2, atol=6e-2), \
        float(jnp.max(jnp.abs(out_a - ref_a)))

    # Config B: 2 nearest x0.5 stages, no channel remap.
    resc_b = SpatialRescalerPallas(n_stages=2, method="nearest", multiplier=0.5,
                                   in_channels=Cin)
    out_b = resc_b(x)
    jax.block_until_ready(out_b)
    assert out_b.shape == (B, Cin, 4, 4), out_b.shape
    ref_b = x[:, :, ::4, ::4]      # nearest x0.5 twice picks source index 4*i
    assert jnp.allclose(out_b, ref_b, rtol=1e-2, atol=1e-2), \
        float(jnp.max(jnp.abs(out_b - ref_b)))

    assert jnp.all(jnp.isfinite(out_a)) and jnp.all(jnp.isfinite(out_b))
    print("KERNEL_OK")
</pallas_src>

<mosaic_0001>
module attributes {stable_mosaic.version = 11 : i64} {
  func.func @_rescaler_kernel(%arg0: i32, %arg1: memref<1x3x16x16xf32, #tpu.memory_space<vmem>>, %arg2: memref<16x8xbf16, #tpu.memory_space<vmem>>, %arg3: memref<8x16xbf16, #tpu.memory_space<vmem>>, %arg4: memref<4x3xf32, #tpu.memory_space<smem>>, %arg5: memref<1x4x8x8xf32, #tpu.memory_space<vmem>>) attributes {dimension_semantics = [#tpu.dimension_semantics<parallel>], iteration_bounds = array<i64: 2>, scalar_prefetch = 0 : i64, scratch_operands = 0 : i64, tpu.core_type = #tpu.core_type<tc>, window_params = [{transform_indices = @transform_0, window_bounds = array<i64: 1, 3, 16, 16>}, {pipeline_mode = #tpu.pipeline_mode<synchronous>, transform_indices = @transform_1, window_bounds = array<i64: 16, 8>}, {pipeline_mode = #tpu.pipeline_mode<synchronous>, transform_indices = @transform_2, window_bounds = array<i64: 8, 16>}, {transform_indices = @transform_3, window_bounds = array<i64: 4, 3>}, {transform_indices = @transform_4, window_bounds = array<i64: 1, 4, 8, 8>}]} {
    %c0 = arith.constant 0 : index
    %c0_0 = arith.constant 0 : index
    %c0_1 = arith.constant 0 : index
    %c0_2 = arith.constant 0 : index
    %0 = vector.load %arg1[%c0, %c0_0, %c0_1, %c0_2] : memref<1x3x16x16xf32, #tpu.memory_space<vmem>>, vector<1x3x16x16xf32>
    %1 = arith.truncf %0 : vector<1x3x16x16xf32> to vector<1x3x16x16xbf16>
    %2 = vector.shape_cast %1 : vector<1x3x16x16xbf16> to vector<3x16x16xbf16>
    %c0_3 = arith.constant 0 : index
    %c0_4 = arith.constant 0 : index
    %3 = vector.load %arg2[%c0_3, %c0_4] : memref<16x8xbf16, #tpu.memory_space<vmem>>, vector<16x8xbf16>
    %c0_5 = arith.constant 0 : index
    %c0_6 = arith.constant 0 : index
    %4 = vector.load %arg3[%c0_5, %c0_6] : memref<8x16xbf16, #tpu.memory_space<vmem>>, vector<8x16xbf16>
    %5 = vector.shape_cast %3 : vector<16x8xbf16> to vector<1x16x8xbf16>
    %6 = vector.shape_cast %5 : vector<1x16x8xbf16> to vector<1x16x8xbf16>
    %7 = vector.broadcast %6 : vector<1x16x8xbf16> to vector<3x16x8xbf16>
    %cst = arith.constant dense<0.000000e+00> : vector<3x16x8xf32>
    %8 = tpu.matmul %2, %7, %cst {dimension_numbers = #tpu.dot_dimension_numbers<[2], [1], [1], [2], [0, 0, 0, 1, 1, 2], [0], [0]>} : vector<3x16x16xbf16>, vector<3x16x8xbf16>, vector<3x16x8xf32> -> vector<3x16x8xf32>
    %9 = arith.truncf %8 : vector<3x16x8xf32> to vector<3x16x8xbf16>
    %10 = vector.shape_cast %4 : vector<8x16xbf16> to vector<1x8x16xbf16>
    %11 = vector.shape_cast %10 : vector<1x8x16xbf16> to vector<1x8x16xbf16>
    %12 = vector.broadcast %11 : vector<1x8x16xbf16> to vector<3x8x16xbf16>
    %cst_7 = arith.constant dense<0.000000e+00> : vector<3x8x8xf32>
    %13 = tpu.matmul %12, %9, %cst_7 {dimension_numbers = #tpu.dot_dimension_numbers<[2], [1], [1], [2], [0, 0, 0, 1, 1, 2], [0], [0]>} : vector<3x8x16xbf16>, vector<3x16x8xbf16>, vector<3x8x8xf32> -> vector<3x8x8xf32>
    %14 = vector.shape_cast %13 : vector<3x8x8xf32> to vector<1x3x8x8xf32>
    %c0_8 = arith.constant 0 : index
    %c0_9 = arith.constant 0 : index
    %15 = memref.load %arg4[%c0_8, %c0_9] : memref<4x3xf32, #tpu.memory_space<smem>>
    %16 = vector.extract_strided_slice %14 {offsets = [0, 0, 0, 0], sizes = [1, 1, 8, 8], strides = [1, 1, 1, 1]} : vector<1x3x8x8xf32> to vector<1x1x8x8xf32>
    %17 = vector.shape_cast %16 : vector<1x1x8x8xf32> to vector<1x8x8xf32>
    %18 = vector.broadcast %15 : f32 to vector<1x8x8xf32>
    %19 = arith.mulf %18, %17 : vector<1x8x8xf32>
    %c0_10 = arith.constant 0 : index
    %c1 = arith.constant 1 : index
    %20 = memref.load %arg4[%c0_10, %c1] : memref<4x3xf32, #tpu.memory_space<smem>>
    %21 = vector.extract_strided_slice %14 {offsets = [0, 1, 0, 0], sizes = [1, 1, 8, 8], strides = [1, 1, 1, 1]} : vector<1x3x8x8xf32> to vector<1x1x8x8xf32>
    %22 = vector.shape_cast %21 : vector<1x1x8x8xf32> to vector<1x8x8xf32>
    %23 = vector.broadcast %20 : f32 to vector<1x8x8xf32>
    %24 = arith.mulf %23, %22 : vector<1x8x8xf32>
    %25 = arith.addf %19, %24 : vector<1x8x8xf32>
    %c0_11 = arith.constant 0 : index
    %c2 = arith.constant 2 : index
    %26 = memref.load %arg4[%c0_11, %c2] : memref<4x3xf32, #tpu.memory_space<smem>>
    %27 = vector.extract_strided_slice %14 {offsets = [0, 2, 0, 0], sizes = [1, 1, 8, 8], strides = [1, 1, 1, 1]} : vector<1x3x8x8xf32> to vector<1x1x8x8xf32>
    %28 = vector.shape_cast %27 : vector<1x1x8x8xf32> to vector<1x8x8xf32>
    %29 = vector.broadcast %26 : f32 to vector<1x8x8xf32>
    %30 = arith.mulf %29, %28 : vector<1x8x8xf32>
    %31 = arith.addf %25, %30 : vector<1x8x8xf32>
    %c1_12 = arith.constant 1 : index
    %c0_13 = arith.constant 0 : index
    %32 = memref.load %arg4[%c1_12, %c0_13] : memref<4x3xf32, #tpu.memory_space<smem>>
    %33 = vector.extract_strided_slice %14 {offsets = [0, 0, 0, 0], sizes = [1, 1, 8, 8], strides = [1, 1, 1, 1]} : vector<1x3x8x8xf32> to vector<1x1x8x8xf32>
    %34 = vector.shape_cast %33 : vector<1x1x8x8xf32> to vector<1x8x8xf32>
    %35 = vector.broadcast %32 : f32 to vector<1x8x8xf32>
    %36 = arith.mulf %35, %34 : vector<1x8x8xf32>
    %c1_14 = arith.constant 1 : index
    %c1_15 = arith.constant 1 : index
    %37 = memref.load %arg4[%c1_14, %c1_15] : memref<4x3xf32, #tpu.memory_space<smem>>
    %38 = vector.extract_strided_slice %14 {offsets = [0, 1, 0, 0], sizes = [1, 1, 8, 8], strides = [1, 1, 1, 1]} : vector<1x3x8x8xf32> to vector<1x1x8x8xf32>
    %39 = vector.shape_cast %38 : vector<1x1x8x8xf32> to vector<1x8x8xf32>
    %40 = vector.broadcast %37 : f32 to vector<1x8x8xf32>
    %41 = arith.mulf %40, %39 : vector<1x8x8xf32>
    %42 = arith.addf %36, %41 : vector<1x8x8xf32>
    %c1_16 = arith.constant 1 : index
    %c2_17 = arith.constant 2 : index
    %43 = memref.load %arg4[%c1_16, %c2_17] : memref<4x3xf32, #tpu.memory_space<smem>>
    %44 = vector.extract_strided_slice %14 {offsets = [0, 2, 0, 0], sizes = [1, 1, 8, 8], strides = [1, 1, 1, 1]} : vector<1x3x8x8xf32> to vector<1x1x8x8xf32>
    %45 = vector.shape_cast %44 : vector<1x1x8x8xf32> to vector<1x8x8xf32>
    %46 = vector.broadcast %43 : f32 to vector<1x8x8xf32>
    %47 = arith.mulf %46, %45 : vector<1x8x8xf32>
    %48 = arith.addf %42, %47 : vector<1x8x8xf32>
    %c2_18 = arith.constant 2 : index
    %c0_19 = arith.constant 0 : index
    %49 = memref.load %arg4[%c2_18, %c0_19] : memref<4x3xf32, #tpu.memory_space<smem>>
    %50 = vector.extract_strided_slice %14 {offsets = [0, 0, 0, 0], sizes = [1, 1, 8, 8], strides = [1, 1, 1, 1]} : vector<1x3x8x8xf32> to vector<1x1x8x8xf32>
    %51 = vector.shape_cast %50 : vector<1x1x8x8xf32> to vector<1x8x8xf32>
    %52 = vector.broadcast %49 : f32 to vector<1x8x8xf32>
    %53 = arith.mulf %52, %51 : vector<1x8x8xf32>
    %c2_20 = arith.constant 2 : index
    %c1_21 = arith.constant 1 : index
    %54 = memref.load %arg4[%c2_20, %c1_21] : memref<4x3xf32, #tpu.memory_space<smem>>
    %55 = vector.extract_strided_slice %14 {offsets = [0, 1, 0, 0], sizes = [1, 1, 8, 8], strides = [1, 1, 1, 1]} : vector<1x3x8x8xf32> to vector<1x1x8x8xf32>
    %56 = vector.shape_cast %55 : vector<1x1x8x8xf32> to vector<1x8x8xf32>
    %57 = vector.broadcast %54 : f32 to vector<1x8x8xf32>
    %58 = arith.mulf %57, %56 : vector<1x8x8xf32>
    %59 = arith.addf %53, %58 : vector<1x8x8xf32>
    %c2_22 = arith.constant 2 : index
    %c2_23 = arith.constant 2 : index
    %60 = memref.load %arg4[%c2_22, %c2_23] : memref<4x3xf32, #tpu.memory_space<smem>>
    %61 = vector.extract_strided_slice %14 {offsets = [0, 2, 0, 0], sizes = [1, 1, 8, 8], strides = [1, 1, 1, 1]} : vector<1x3x8x8xf32> to vector<1x1x8x8xf32>
    %62 = vector.shape_cast %61 : vector<1x1x8x8xf32> to vector<1x8x8xf32>
    %63 = vector.broadcast %60 : f32 to vector<1x8x8xf32>
    %64 = arith.mulf %63, %62 : vector<1x8x8xf32>
    %65 = arith.addf %59, %64 : vector<1x8x8xf32>
    %c3 = arith.constant 3 : index
    %c0_24 = arith.constant 0 : index
    %66 = memref.load %arg4[%c3, %c0_24] : memref<4x3xf32, #tpu.memory_space<smem>>
    %67 = vector.extract_strided_slice %14 {offsets = [0, 0, 0, 0], sizes = [1, 1, 8, 8], strides = [1, 1, 1, 1]} : vector<1x3x8x8xf32> to vector<1x1x8x8xf32>
    %68 = vector.shape_cast %67 : vector<1x1x8x8xf32> to vector<1x8x8xf32>
    %69 = vector.broadcast %66 : f32 to vector<1x8x8xf32>
    %70 = arith.mulf %69, %68 : vector<1x8x8xf32>
    %c3_25 = arith.constant 3 : index
    %c1_26 = arith.constant 1 : index
    %71 = memref.load %arg4[%c3_25, %c1_26] : memref<4x3xf32, #tpu.memory_space<smem>>
    %72 = vector.extract_strided_slice %14 {offsets = [0, 1, 0, 0], sizes = [1, 1, 8, 8], strides = [1, 1, 1, 1]} : vector<1x3x8x8xf32> to vector<1x1x8x8xf32>
    %73 = vector.shape_cast %72 : vector<1x1x8x8xf32> to vector<1x8x8xf32>
    %74 = vector.broadcast %71 : f32 to vector<1x8x8xf32>
    %75 = arith.mulf %74, %73 : vector<1x8x8xf32>
    %76 = arith.addf %70, %75 : vector<1x8x8xf32>
    %c3_27 = arith.constant 3 : index
    %c2_28 = arith.constant 2 : index
    %77 = memref.load %arg4[%c3_27, %c2_28] : memref<4x3xf32, #tpu.memory_space<smem>>
    %78 = vector.extract_strided_slice %14 {offsets = [0, 2, 0, 0], sizes = [1, 1, 8, 8], strides = [1, 1, 1, 1]} : vector<1x3x8x8xf32> to vector<1x1x8x8xf32>
    %79 = vector.shape_cast %78 : vector<1x1x8x8xf32> to vector<1x8x8xf32>
    %80 = vector.broadcast %77 : f32 to vector<1x8x8xf32>
    %81 = arith.mulf %80, %79 : vector<1x8x8xf32>
    %82 = arith.addf %76, %81 : vector<1x8x8xf32>
    %83 = vector.shape_cast %31 : vector<1x8x8xf32> to vector<1x1x8x8xf32>
    %84 = vector.shape_cast %48 : vector<1x8x8xf32> to vector<1x1x8x8xf32>
    %85 = vector.shape_cast %65 : vector<1x8x8xf32> to vector<1x1x8x8xf32>
    %86 = vector.shape_cast %82 : vector<1x8x8xf32> to vector<1x1x8x8xf32>
    %87 = tpu.concatenate %83, %84, %85, %86 in 1 : vector<1x1x8x8xf32>, vector<1x1x8x8xf32>, vector<1x1x8x8xf32>, vector<1x1x8x8xf32> -> vector<1x4x8x8xf32>
    %c0_29 = arith.constant 0 : index
    %c0_30 = arith.constant 0 : index
    %c0_31 = arith.constant 0 : index
    %c0_32 = arith.constant 0 : index
    %88 = vector.load %arg5[%c0_29, %c0_30, %c0_31, %c0_32] : memref<1x4x8x8xf32, #tpu.memory_space<vmem>>, vector<1x4x8x8xf32>
    tpu.vector_store %arg5[%c0_29, %c0_30, %c0_31, %c0_32], %87 {strides = array<i32>} : memref<1x4x8x8xf32, #tpu.memory_space<vmem>>, vector<1x4x8x8xf32>,
    return
  }
  func.func @transform_0(%arg0: i32) -> (i32, i32, i32, i32) {
    %c0_i32 = arith.constant 0 : i32
    %c0_i32_0 = arith.constant 0 : i32
    %c0_i32_1 = arith.constant 0 : i32
    %c0_i32_2 = arith.constant 0 : i32
    return %arg0, %c0_i32, %c0_i32_0, %c0_i32_1 : i32, i32, i32, i32
  }
  func.func @transform_1(%arg0: i32) -> (i32, i32) {
    %c0_i32 = arith.constant 0 : i32
    %c0_i32_0 = arith.constant 0 : i32
    %c0_i32_1 = arith.constant 0 : i32
    return %c0_i32, %c0_i32_0 : i32, i32
  }
  func.func @transform_2(%arg0: i32) -> (i32, i32) {
    %c0_i32 = arith.constant 0 : i32
    %c0_i32_0 = arith.constant 0 : i32
    %c0_i32_1 = arith.constant 0 : i32
    return %c0_i32, %c0_i32_0 : i32, i32
  }
  func.func @transform_3(%arg0: i32) -> (i32, i32) {
    %c0_i32 = arith.constant 0 : i32
    %c0_i32_0 = arith.constant 0 : i32
    %c0_i32_1 = arith.constant 0 : i32
    return %c0_i32, %c0_i32_0 : i32, i32
  }
  func.func @transform_4(%arg0: i32) -> (i32, i32, i32, i32) {
    %c0_i32 = arith.constant 0 : i32
    %c0_i32_0 = arith.constant 0 : i32
    %c0_i32_1 = arith.constant 0 : i32
    %c0_i32_2 = arith.constant 0 : i32
    return %arg0, %c0_i32, %c0_i32_0, %c0_i32_1 : i32, i32, i32, i32
  }
}

</mosaic_0001>

<bundles_post_ra>
// kernel: tpu_custom_call.1
= control target key start
LH: loop header
LB: loop body
LE: loop exit
PB: predicated region body
PF: predicated region fallthrough
CT: control target
= control target key end

     0   :  { %9 = vsyncpa [#allocation3], 0  ;;  %s1162_s0 = inlined_call_operand.hbm [shape: f32[2,3,16,16], index: 0, kind: input, shape index: {}]   ;;  %s1163_s1 = inlined_call_operand.vmem [shape: bf16[16,8], index: 1, kind: input, shape index: {}]   ;;  %s1164_s2 = inlined_call_operand.vmem [shape: bf16[8,16], index: 2, kind: input, shape index: {}]   ;;  %s1165_s3 = inlined_call_operand.vmem [shape: f32[4,3], index: 3, kind: input, shape index: {}]   ;;  %s1166_s4 = inlined_call_operand.hbm [shape: f32[2,4,8,8], index: 4, kind: output, shape index: {}]  }
   0x1   :  { %11 = vsyncpa [#allocation3 + $0x1], 0 }
   0x2   :  { %12 = vsyncpa [#allocation5], 0 }
   0x3   :  { %13 = vsyncpa [#allocation4], 0 }
   0x4   :  { %15 = vsyncpa [#allocation4 + $0x1], 0  ;;  %s950_s15 = smov 0   ;;  %s952_s16 = smov 0  }
   0x5   :  { %s954_s17 = smov 0   ;;  %s956_s18 = smov 0  }
   0x6 LB: > { %s971_s19 = sadd.s32 4294967295, %s914_s18   ;;  %s656_s20 = sadd.s32 4294967294, %s914_s18   ;;  %s914_s18 = sphi %s956_s18, %s1188_s18   ;;  %s910_s17 = sphi %s954_s17, %s1187_s17   ;;  %s906_s16 = sphi %s952_s16, %s1186_s16   ;;  %s902_s15 = sphi %s950_s15, %s1185_s15  }
   0x7   : > { %s975_s21 = sadd.s32 1, %s914_s18   ;;  %s28_s22 = sadd.s32 1, %s910_s17 }
   0x8   : > { %s25_s23 = ssub.s32 %s914_s18, %s975_s21  ;;  %p35_p0 = scmp.ne.s32.totalorder %s910_s17, %s906_s16 }
   0x9   : > { %p26_p1 = scmp.eq.s32.totalorder %s25_s23, 0  ;;  %p36_p2 = scmp.eq.s32.totalorder %s914_s18, 0 }
   0xa   : > { %p41_p3 = scmp.ne.s32.totalorder %s906_s16, %s902_s15  ;;  %p1168_p4 = scmp.eq.s32.totalorder %s971_s19, 0 }
   0xb   : > { %s987_s24 = scalar_select %p26_p1, %s910_s17, %s28_s22  }
   0xc   : > { %p989_p5 = por %p36_p2, %p35_p0  ;;  %p995_p6 = por %p1168_p4, %p41_p3 }
   0xd   : > { %p128_p7 = scmp.eq.s32.totalorder %s971_s19, 1  ;;  %p134_p8 = scmp.eq.s32.totalorder %s656_s20, 1 }
   0xe   : > { %s1172_s26 = scalar_select %p995_p6, 1, 0 }
   0xf   : > { %p657_p9 = scmp.ge.s32.totalorder %s914_s18, 1  ;;  %p141_p10 = scmp.lt.s32.totalorder %s914_s18, 3 }
  0x10   : > { %p1002_p11 = por %p128_p7, %p35_p0  ;;  %p1006_p12 = por %p134_p8, %p41_p3 }
  0x11   : > { %p1010_p13 = pnand %p657_p9, %p141_p10  ;;  %s160_s6 = sshll.u32 %s1165_s3, 4  ;;  %s161_s6 = int_to_ptr.vmem [resolvable:$true] %s160_s6 }
  0x12   : > { %s1173_s27 = scalar_select %p1002_p11, 1, 0 }
  0x13   : > { %s1174_s28 = scalar_select %p1006_p12, 1, 0 }
  0x14   : > { %s1175_s29 = scalar_select %p1010_p13, 1, 0 }
  0x15   : > { %p747_p1 = pneg %p1010_p13  ;;  %p760_p2 = scmp.lt.s32.totalorder %s914_s18, 2 }
  0x16   : > { %s171_s8 = sand.u32 1, %s910_s17   ;;  %s803_s11 = scalar_lea.vmem %s161_s6, 64 }
  0x17   : > { %p1023_p7 = pnand %p747_p1, %p1168_p4  ;;  %p1030_p3 = pnand %p760_p2, %p989_p5 }
  0x18   : > { %s736_s10 = smul.u32 48, %s171_s8  ;;  %p804_p8 = scmp.ne.s32.totalorder %s161_s6, %s803_s11 }
  0x19   : > { %p805_p9 = pneg %p1023_p7  ;;  %p811_p12 = scmp.lt.s32.totalorder %s161_s6, %s161_s6 }
  0x1a   : > { %p812_p11 = scmp.lt.s32.totalorder %s803_s11, %s803_s11 }
  0x1b   : > { %p806_p10 = pnand %p805_p9, %p804_p8 }
  0x1c   : > { %p813_p1 = por %p812_p11, %p811_p12 }
  0x1d   : > { %p807_p0 = pneg %p806_p10 }
  0x1f   : > { %p814_p4 = pnand %p813_p1, %p807_p0 }
  0x21   : > { %817 = shalt.err (!%p814_p4)
}
  0x22   : > { %s916_s12 = smov [#allocation6]   ;;  %s737_s13 = smul.u32 768, %s914_s18 }
  0x23   : > { %750 = dma.vmem_to_smem (!%p1023_p7), %s161_s6, 64, %s916_s12, [#allocation5]  }
  0x24   : > { %s175_s14 = scalar_lea.vmem [#allocation2], %s736_s10  ;;  %s1044_s25 = scalar_lea.hbm %s1162_s0, %s737_s13 }
  0x25   : > { %s182_s20 = sshll.u32 %s175_s14, 4  ;;  %s1046_s30 = scalar_lea.sflag [#allocation3], %s171_s8  ;;  %s1039_s20 = int_to_ptr.vmem [resolvable:$true] %s182_s20 }
  0x26   : > { %s818_s5 = scalar_lea.hbm %s1044_s25, 768  ;;  %p820_p5 = pneg %p1030_p3 }
  0x27   : > { %p819_p4 = scmp.ne.s32.totalorder %s1044_s25, %s818_s5  ;;  %s823_s10 = scalar_lea.hbm %s1162_s0, 1536 }
  0x28   : > { %p824_p0 = scmp.lt.s32.totalorder %s1044_s25, %s1162_s0  ;;  %p825_p2 = scmp.lt.s32.totalorder %s823_s10, %s818_s5 }
  0x29   : > { %p821_p11 = pnand %p820_p5, %p819_p4 }
  0x2a   : > { %p826_p7 = por %p825_p2, %p824_p0 }
  0x2b   : > { %p822_p12 = pneg %p821_p11 }
  0x2d   : > { %p827_p8 = pnand %p826_p7, %p822_p12 }
  0x2f   : > { %830 = shalt.err (!%p827_p8)
}
  0x30   : > { %s831_s8 = scalar_lea.vmem %s1039_s20, 768  ;;  %s917_s13 = smov [#allocation2]  }
  0x31   : > { %p832_p9 = scmp.ne.s32.totalorder %s1039_s20, %s831_s8  ;;  %s836_s14 = sshll.u32 %s917_s13, 4  ;;  %s837_s14 = int_to_ptr.vmem [resolvable:$false] %s836_s14 }
  0x32   : > { %s838_s22 = scalar_lea.vmem %s837_s14, 1536  ;;  %p839_p4 = scmp.lt.s32.totalorder %s1039_s20, %s837_s14 }
  0x33   : > { %p834_p10 = pnand %p832_p9, %p820_p5  ;;  %p840_p11 = scmp.lt.s32.totalorder %s838_s22, %s831_s8 }
  0x35   : > { %p835_p1 = pneg %p834_p10  ;;  %p841_p6 = por %p840_p11, %p839_p4 }
  0x37   : > { %p842_p13 = pnand %p841_p6, %p835_p1 }
  0x39   : > { %845 = shalt.err (!%p842_p13)
}
  0x3a   : > { %s918_s23 = smov 128   ;;  %s919_s5 = smov 8  }
  0x3b   : > { %754 = dma.hbm_to_vmem [thread:$0]  (!%p1030_p3), %s1044_s25, 768, %s1039_s20, %s1046_s30, %s918_s23, %s918_s23, %s919_s5  }
  0x3c   : > { %p1178_p5 = scmp.ne.s32.totalorder %s1175_s29, 0 }
  0x3d   : > { %s1070_s6 = sand.u32 (!%p1178_p5), 1, %s906_s16   ;;  %p1179_p6 = scmp.ne.s32.totalorder (!%p1178_p5), %s1172_s26, 0 }
  0x3e   : > { %194 = sbr.rel (%p1178_p5) target bundleno = 501 (0x1f5), region = 36  ;;  %s197_s10 = scalar_lea.sflag (!%p1178_p5), [#allocation3], %s1070_s6 }
  0x3f   : > { %s738_s7 = smul.u32 (!%p1178_p5), 48, %s1070_s6 }
  0x41   : > { %s200_s11 = scalar_lea.vmem (!%p1178_p5), [#allocation2], %s738_s7 }
  0x43   : > { %889 = dma.done.wait (%p1179_p6), %s197_s10, 768  }
  0x44   : > { %891 = vsyncadd (%p1179_p6), %s197_s10, 4294966528  ;;  %p1180_p13 = scmp.eq.s32.totalorder %s971_s19, 0 }
  0x46   : > { %893 = dma.done.wait (%p1180_p13), [#allocation5], 64   ;;  %p1181_p3 = pmov %p1180_p13 }
  0x48   : > { %895 = vsyncadd (%p1181_p3), [#allocation5], 4294967232 }
  0x49   : > { %209 = sfence }
  0x4a   : > { %v802_v0 = vld [vmem:[%s1163_s1] sm:$0xff]   ;;  %v920_v1 = vmov 0.0   ;;  %v232_v3 = vld [vmem:[%s200_s11 + $0x8] sm:$0xff]  ;;  %vm249_vm0 = vcmask 130048   ;;  %v234_v6 = vld [vmem:[%s200_s11 + $0x18] sm:$0xff]  ;;  %vm921_vm1 = vmmov 0  }
  0x4b   : > { %700 = vmatprep.subr.bf16.mxu0 %v920_v1  ;;  %706 = vmatprep.subr.bf16.mxu1 %v920_v1  ;;  %v231_v2 = vld [vmem:[%s200_s11] sm:$0xff]  ;;  %v233_v4 = vld [vmem:[%s200_s11 + $0x10] sm:$0xff]  ;;  %v236_v9 = vld [vmem:[%s200_s11 + $0x28] sm:$0xff]  ;;  %s508_s25 = sld [smem:[#allocation6]]  ;;  %s663_s29 = sshll.u32 %s1070_s6, 5  ;;  %vm552_vm2 = vcmask 64512  }
  0x4c   : > { %701 = vmatpush3.bf16.msra.mxu0 %v802_v0  ;;  %707 = vmatpush3.bf16.msra.mxu1 %v802_v0  ;;  %v237_v5 = vpack.c.bf16 %v232_v3, %v231_v2  ;;  %v238_v7 = vpack.c.bf16 %v234_v6, %v233_v4  ;;  %v235_v8 = vld [vmem:[%s200_s11 + $0x20] sm:$0xff]  ;;  %s673_s30 = sld [smem:[#allocation6 + $0x80]]  ;;  %s687_s9 = sshll.u32 %s971_s19, 9 }
  0x4d   : > { %702 = vmatprep.mubr.msk.bf16.mxu0 %vm921_vm1, %v920_v1  ;;  %708 = vmatprep.mubr.msk.bf16.mxu1 %vm921_vm1, %v920_v1  ;;  %v239_v10 = vpack.c.bf16 %v236_v9, %v235_v8  ;;  %v242_v21 = vld [vmem:[%s1164_s2] sm:$0xf]  ;;  %s676_s12 = sld [smem:[#allocation6 + $0x100]]  ;;  %s229_s26 = scalar_lea.vmem [#allocation7], %s663_s29 }
  0x4e   : > { %712 = vmatprep.subr.bf16.mxu0 %v920_v1  ;;  %718 = vmatprep.subr.bf16.mxu1 %v920_v1  ;;  %s679_s8 = sld [smem:[#allocation6 + $0x180]]  ;;  %s571_s20 = sshll.u32 %s229_s26, 4  ;;  %s1119_s20 = int_to_ptr.vmem [resolvable:$true] %s571_s20 }
  0x4f   : > { %703 = vmatmul.mubr.msk.bf16.vlgmr.msra.gmra.mxu0 %vm249_vm0, %v237_v5  ;;  %709 = vmatmul.mubr.msk.bf16.vlgmr.msra.gmra.mxu1 %vm249_vm0, %v238_v7  ;;  %s671_s13 = sld [smem:[#allocation6 + $0x1]]  ;;  %s558_s19 = scalar_lea.sflag [#allocation4], %s1070_s6 }
  0x50   : > { %713 = vmatpush3.bf16.msra.mxu0 %v802_v0  ;;  %714 = vmatprep.mubr.msk.bf16.mxu0 %vm921_vm1, %v920_v1  ;;  %s674_s14 = sld [smem:[#allocation6 + $0x81]]  ;;  %p1182_p0 = scmp.ne.s32.totalorder %s1173_s27, 0 }
  0x51   : > { %724 = vmatprep.subr.bf16.mxu0 %v920_v1  ;;  %720 = vmatprep.mubr.msk.bf16.mxu1 %vm921_vm1, %v920_v1  ;;  %s677_s22 = sld [smem:[#allocation6 + $0x101]]  ;;  %v509_v28 = vstv %s508_s25 }
  0x52   : > { %s680_s23 = sld [smem:[#allocation6 + $0x181]]  ;;  %v520_v29 = vstv %s673_s30 }
  0x53   : > { %s1100_s5 = sld [smem:[#allocation6 + $0x2]]  ;;  %v531_v30 = vstv %s676_s12  ;;  %s1117_s12 = scalar_lea.hbm %s1166_s4, %s687_s9 }
  0x54   : > { %s1102_s7 = sld [smem:[#allocation6 + $0x82]]  ;;  %v542_v31 = vstv %s679_s8  ;;  %s846_s8 = scalar_lea.vmem %s1119_s20, 512 }
  0x55   : > { %s1104_s10 = sld [smem:[#allocation6 + $0x102]]  ;;  %v512_v33 = vstv %s671_s13  ;;  %p847_p12 = scmp.ne.s32.totalorder %s1119_s20, %s846_s8 }
  0x56   : > { %s1106_s11 = sld [smem:[#allocation6 + $0x182]]  ;;  %v523_v34 = vstv %s674_s14  ;;  %s922_s13 = smov [#allocation7]  }
  0x57   : > { %715 = vmatmul.mubr.msk.bf16.vlgmr.msra.gmra.mxu0 %vm249_vm0, %v239_v10  ;;  %v534_v35 = vstv %s677_s22  ;;  %p848_p2 = pnand %p847_p12, %p1182_p0  ;;  %s850_s14 = sshll.u32 %s922_s13, 4  ;;  %s851_s14 = int_to_ptr.vmem [resolvable:$false] %s850_s14 }
  0x58   : > { %726 = vmatprep.mubr.msk.bf16.mxu0 %vm921_vm1, %v920_v1  ;;  %v545_v36 = vstv %s680_s23  ;;  %s852_s22 = scalar_lea.vmem %s851_s14, 1024  ;;  %p853_p8 = scmp.lt.s32.totalorder %s1119_s20, %s851_s14 }
  0x59   : > { %v516_v50 = vstv %s1100_s5  ;;  %p849_p7 = pneg %p848_p2  ;;  %p854_p9 = scmp.lt.s32.totalorder %s852_s22, %s846_s8 }
  0x5a   : > { %v527_v51 = vstv %s1102_s7 }
  0x5b   : > { %v538_v52 = vstv %s1104_s10  ;;  %p855_p10 = por %p854_p9, %p853_p8 }
  0x5c   : > { %v549_v53 = vstv %s1106_s11 }
  0x5d   : > { %p856_p1 = pnand %p855_p10, %p849_p7 }
 0x10f   : > { %v287_v11 = vpop.f32.mrf.mxu0  ;;  %v331_v12 = vpop.f32.mrf.mxu1 }
 0x111   : > { %v704_v13 = vpop.f32.mrf.mxu0  ;;  %v710_v14 = vpop.f32.mrf.mxu1 }
 0x113   : > { %v290_v15 = vpop.f32.mrf.mxu0  ;;  %v334_v16 = vpop.f32.mrf.mxu1 }
 0x114   : > { %v382_v17 = vpack.c.bf16 %v290_v15, %v287_v11  ;;  %v383_v18 = vpack.c.bf16 %v334_v16, %v331_v12 }
 0x115   : > { %v705_v19 = vpop.f32.mrf.mxu0  ;;  %v711_v20 = vpop.f32.mrf.mxu1 }
 0x116   : > { %719 = vmatpush3.bf16.msra.mxu1 %v382_v17  ;;  %725 = vmatpush3.bf16.msra.mxu0 %v383_v18 }
 0x117   : > { %v375_v22 = vpop.f32.mrf.mxu0  ;;  %730 = vmatprep.subr.bf16.mxu1 %v920_v1 }
 0x119   : > { %v716_v23 = vpop.f32.mrf.mxu0  ;;  %721 = vmatmul.mubr.msk.bf16.vlgmr.msra.gmra.mxu1 %vm249_vm0, %v242_v21  ;;  %727 = vmatmul.mubr.msk.bf16.vlgmr.msra.gmra.mxu0 %vm249_vm0, %v242_v21 }
 0x11a   : > { %732 = vmatprep.mubr.msk.bf16.mxu1 %vm921_vm1, %v920_v1 }
 0x11b   : > { %v378_v24 = vpop.f32.mrf.mxu0 }
 0x11c   : > { %v384_v25 = vpack.c.bf16 %v378_v24, %v375_v22 }
 0x11d   : > { %v717_v26 = vpop.f32.mrf.mxu0 }
 0x11e   : > { %731 = vmatpush3.bf16.msra.mxu1 %v384_v25 }
 0x121   : > { %733 = vmatmul.mubr.msk.bf16.vlgmr.msra.gmra.mxu1 %vm249_vm0, %v242_v21 }
 0x1d9   : > { %v422_v27 = vpop.f32.mrf.mxu1  ;;  %v462_v32 = vpop.f32.mrf.mxu0 }
 0x1da   : > { %v510_v39 = vmul.f32 %v509_v28, %v422_v27  ;;  %v521_v40 = vmul.f32 %v520_v29, %v422_v27  ;;  %v532_v41 = vmul.f32 %v531_v30, %v422_v27  ;;  %v543_v42 = vmul.f32 %v542_v31, %v422_v27 }
 0x1db   : > { %v722_v37 = vpop.f32.mrf.mxu1  ;;  %v728_v38 = vpop.f32.mrf.mxu0  ;;  %v513_v44 = vmul.f32 %v512_v33, %v462_v32  ;;  %v524_v45 = vmul.f32 %v523_v34, %v462_v32  ;;  %v535_v46 = vmul.f32 %v534_v35, %v462_v32  ;;  %v546_v47 = vmul.f32 %v545_v36, %v462_v32 }
 0x1dd   : > { %v425_v43 = vpop.f32.mrf.mxu1  ;;  %v465_v48 = vpop.f32.mrf.mxu0  ;;  %v514_v55 = vadd.f32 %v513_v44, %v510_v39  ;;  %v525_v56 = vadd.f32 %v524_v45, %v521_v40  ;;  %v536_v57 = vadd.f32 %v535_v46, %v532_v41  ;;  %v547_v58 = vadd.f32 %v546_v47, %v543_v42 }
 0x1df   : > { %v723_v49 = vpop.f32.mrf.mxu1  ;;  %v729_v54 = vpop.f32.mrf.mxu0 }
 0x1e1   : > { %v502_v59 = vpop.f32.mrf.mxu1 }
 0x1e2   : > { %v517_v60 = vmul.f32 %v516_v50, %v502_v59  ;;  %v528_v61 = vmul.f32 %v527_v51, %v502_v59  ;;  %v539_v62 = vmul.f32 %v538_v52, %v502_v59  ;;  %v550_v63 = vmul.f32 %v549_v53, %v502_v59 }
 0x1e3   : > { %v734_v0 = vpop.f32.mrf.mxu1 }
 0x1e4   : > { %v518_v1 = vadd.f32 %v517_v60, %v514_v55  ;;  %v529_v2 = vadd.f32 %v528_v61, %v525_v56  ;;  %v540_v3 = vadd.f32 %v539_v62, %v536_v57  ;;  %v551_v4 = vadd.f32 %v550_v63, %v547_v58 }
 0x1e5   : > { %v505_v5 = vpop.f32.mrf.mxu1 }
 0x1e6   : > { %553 = vst.msk [vmem:[%s229_s26] sm:$0xff] %vm552_vm2, %v518_v1  ;;  %554 = vst.msk [vmem:[%s229_s26 + $0x8] sm:$0xff] %vm552_vm2, %v529_v2 }
 0x1e7   : > { %555 = vst.msk [vmem:[%s229_s26 + $0x10] sm:$0xff] %vm552_vm2, %v540_v3  ;;  %556 = vst.msk [vmem:[%s229_s26 + $0x18] sm:$0xff] %vm552_vm2, %v551_v4  ;;  %v735_v6 = vpop.f32.mrf.mxu1 }
 0x1e8   : > { %859 = shalt.err (!%p856_p1)
}
 0x1e9   : > { %s860_s23 = scalar_lea.hbm %s1117_s12, 512  ;;  %s864_s10 = scalar_lea.hbm %s1166_s4, 1024 }
 0x1ea   : > { %p861_p4 = scmp.ne.s32.totalorder %s1117_s12, %s860_s23  ;;  %p865_p6 = scmp.lt.s32.totalorder %s1117_s12, %s1166_s4 }
 0x1eb   : > { %p866_p13 = scmp.lt.s32.totalorder %s864_s10, %s860_s23 }
 0x1ec   : > { %p862_p11 = pnand %p861_p4, %p1182_p0 }
 0x1ed   : > { %p867_p3 = por %p866_p13, %p865_p6 }
 0x1ee   : > { %p863_p5 = pneg %p862_p11 }
 0x1f0   : > { %p868_p12 = pnand %p867_p3, %p863_p5 }
 0x1f2   : > { %871 = shalt.err (!%p868_p12)
}
 0x1f3   : > { %s923_s9 = smov 128   ;;  %s924_s26 = smov 8  }
 0x1f4   : > { %745 = dma.vmem_to_hbm [thread:$0]  (%p1182_p0), %s1119_s20, 512, %s1117_s12, %s558_s19, %s923_s9, %s923_s9, %s924_s26  }
 0x1f5 PF: > { %s586_s25 = sand.u32 1, %s902_s15   ;;  %p1183_p2 = scmp.ne.s32.totalorder %s1174_s28, 0 }
 0x1f6   : > { %p1184_p7 = scmp.ge.s32.totalorder %s914_s18, 2  ;;  %s587_s30 = scalar_lea.sflag [#allocation4], %s586_s25 }
 0x1f8   : > { %p756_p8 = pnand %p1184_p7, %p1183_p2 }
 0x1fa   : > { %p757_p9 = pneg %p756_p8 }
 0x1fc   : > { %897 = dma.done.wait (%p757_p9), %s587_s30, 512  }
 0x1fd   : > { %899 = vsyncadd (%p757_p9), %s587_s30, 4294966784  ;;  %p18_p10 = scmp.ge.s32.totalorder %s975_s21, 4   ;;  %s1185_s15 = smov %s906_s16 }
 0x1fe   : > { %s1186_s16 = smov %s910_s17  ;;  %s1187_s17 = smov %s987_s24 }
 0x1ff   : > { %s1188_s18 = smov %s975_s21  ;;  %20 = sbr.rel (!%p18_p10) target bundleno = 6 (0x6), region = 86 }
 0x204   :  { %592 = vsyncpa [#allocation3], 1 }
 0x205   :  { %594 = vsyncpa [#allocation3 + $0x1], 1 }
 0x206   :  { %595 = vsyncpa [#allocation4], 1 }
 0x207   :  { %597 = vsyncpa [#allocation4 + $0x1], 1 }
 0x208   :  { %598 = vsyncpa [#allocation5], 1 }
 0x209   :  { %600 = vsyncpa [#allocation5 + $0x1], 1 }

</bundles_post_ra>
